<compile_context>
chip_gen: v7x
topology: tpu7x:2x2x1
jax: 0.10.0
libtpu: 0.0.40
codegen_flags: <defaults>
</compile_context>

<pallas_src>
import functools

import numpy as np
import jax
import jax.numpy as jnp
from jax import lax
from jax.experimental import pallas as pl
from jax.experimental.pallas import tpu as pltpu


# ----------------------------------------------------------------------------
# Pallas kernel: one TM-row block (rows i) against all Np columns (j).
# ----------------------------------------------------------------------------
def _auprc_kernel(margin, gamma, inv_n, red_ref, ycol_ref, rows_ref, out_ref):
    # red_ref  : (8, Np)    row 0 = valid-column mask, row 1 = positive-column mask
    # ycol_ref : (Np, 1)    predictions of all columns (zero-padded)
    # rows_ref : (1, 8, TM) sublane 0 = y_pred, 1 = pos mask, 2 = gathered u_all,
    #                       3 = gathered u_pos for this row block (rest zero)
    # out_ref  : (1, 8, TM) sublane 0 = u_all_new, 1 = u_pos_new,
    #                       2 = per-row loss contribution (rest zero)
    red = red_ref[...]                     # (8, Np)
    yc = ycol_ref[...]                     # (Np, 1)
    slab = rows_ref[0]                     # (8, TM)

    yb = slab[0:1, :]                      # (1, TM) row-block predictions
    pm = slab[1:2, :]                      # (1, TM) row-block positive mask
    ua = slab[2:3, :]                      # (1, TM) gathered u_all
    up = slab[3:4, :]                      # (1, TM) gathered u_pos

    # sur_t[j, i] = max(margin - (y[i] - y[j]), 0)^2 ; rows i live on lanes.
    d = (margin - yb) + yc                 # (Np, TM)
    s = jnp.maximum(d, 0.0)
    sur_t = s * s

    # One MXU matmul yields both row reductions, lane-dense along i:
    #   rm[0, i] = sum_j valid_j * sur[i, j]
    #   rm[1, i] = sum_j pos_j   * sur[i, j]
    rm = lax.dot_general(red, sur_t,
                         dimension_numbers=(((1,), (0,)), ((), ())),
                         preferred_element_type=jnp.float32,
                         precision=lax.Precision.HIGHEST)       # (8, TM)
    rm_all = rm[0:1, :] * inv_n            # row means over the N real columns
    rm_pos = rm[1:2, :] * inv_n

    # moving-average update (the loss uses the *updated* stats, as in PyTorch)
    u_all_new = (1.0 - gamma) * ua + gamma * rm_all
    u_pos_new = (1.0 - gamma) * up + gamma * rm_pos

    # sum_j p[i,j]*sur[i,j] = N*(u_pos_new*rm_all - u_all_new*rm_pos)/u_all_new^2
    # (the N cancels against the final /(P*N) in the wrapper).
    # Non-positive / padded rows get a denominator >= u_all_new + 1, so the
    # masked contribution is exactly 0 (no inf * 0).
    denom = u_all_new + (1.0 - pm)
    r = pl.reciprocal(denom, approx=True)  # EUP slot
    r = r * (2.0 - denom * r)              # one Newton step -> ~f32 accuracy
    contrib = pm * (u_pos_new * rm_all - u_all_new * rm_pos) * (r * r)

    zeros = jnp.zeros((5, contrib.shape[1]), jnp.float32)
    out_ref[0] = jnp.concatenate([u_all_new, u_pos_new, contrib, zeros], axis=0)


# ----------------------------------------------------------------------------
# Wrapper: gather/scatter of u_all/u_pos, padding, final scalar reduction.
# ----------------------------------------------------------------------------
def auprc_loss_forward(y_pred, y_true, index_s, u_all, u_pos,
                       *, margin=1.0, gamma=0.1, block_rows=128):
    """Functional AUPRC_Loss forward. Returns (loss, (u_all_new, u_pos_new))."""
    f32 = jnp.float32
    yp = y_pred.reshape(-1).astype(f32)
    yt = y_true.reshape(-1).astype(f32)
    idx = index_s.reshape(-1)
    n = yp.shape[0]

    pos_mask = (yt == 1.0).astype(f32)
    u_all_g = u_all[idx, 0].astype(f32)
    u_pos_g = u_pos[idx, 0].astype(f32)

    # Pad batch to a lane-aligned size; TM rows per grid step.
    # (128 is conservative for v5e/v7x; on v6e block_rows=256-512 is also fine.)
    tm = int(block_rows)
    n_pad = ((max(n, 1) + tm - 1) // tm) * tm
    n_pad = ((n_pad + 127) // 128) * 128
    nb = n_pad // tm
    pad = n_pad - n

    yp_p = jnp.pad(yp, (0, pad))
    pm_p = jnp.pad(pos_mask, (0, pad))
    valid = jnp.pad(jnp.ones((n,), f32), (0, pad))
    ua_p = jnp.pad(u_all_g, (0, pad))
    up_p = jnp.pad(u_pos_g, (0, pad))
    zero = jnp.zeros((n_pad,), f32)

    # (8, Np) MXU reduce slab: row 0 = valid-column mask, row 1 = pos-column mask.
    red = jnp.stack([valid, pm_p, zero, zero, zero, zero, zero, zero], axis=0)
    # (Np, 1) all-column predictions.
    y_col = yp_p.reshape(n_pad, 1)
    # (nb, 8, TM) lane-dense per-row-block slab.
    rows = jnp.stack([yp_p, pm_p, ua_p, up_p, zero, zero, zero, zero], axis=0)
    rows = rows.reshape(8, nb, tm).transpose(1, 0, 2)

    kernel = functools.partial(_auprc_kernel, float(margin), float(gamma),
                               float(1.0 / n))

    # conservative per-step VMEM estimate (double-buffered I/O + sur_t temp)
    est = 4 * (2 * 8 * n_pad + 2 * 128 * n_pad + 4 * 8 * tm
               + 2 * n_pad * tm + 8 * tm)
    vmem_limit = int(min(max(2 * est, 16 * 1024 * 1024), 64 * 1024 * 1024))

    out = pl.pallas_call(
        kernel,
        out_shape=jax.ShapeDtypeStruct((nb, 8, tm), f32),
        grid_spec=pltpu.PrefetchScalarGridSpec(
            num_scalar_prefetch=0,
            grid=(nb,),
            in_specs=[
                pl.BlockSpec((8, n_pad), lambda i: (0, 0)),
                pl.BlockSpec((n_pad, 1), lambda i: (0, 0)),
                pl.BlockSpec((1, 8, tm), lambda i: (i, 0, 0)),
            ],
            out_specs=pl.BlockSpec((1, 8, tm), lambda i: (i, 0, 0)),
        ),
        compiler_params=pltpu.CompilerParams(
            dimension_semantics=("parallel",),
            vmem_limit_bytes=vmem_limit,
        ),
    )(red, y_col, rows)

    out = out.transpose(1, 0, 2).reshape(8, n_pad)
    u_all_new_b = out[0, :n]
    u_pos_new_b = out[1, :n]
    contrib = out[2, :]            # padded / non-positive rows are exactly 0

    p_count = jnp.sum(pos_mask)    # NaN loss if no positives, same as torch mean()
    loss = jnp.sum(contrib) / p_count

    # scatter the updated running stats back (only positive rows change)
    is_pos = pos_mask == 1.0
    u_all_out = u_all.at[idx, 0].set(jnp.where(is_pos, u_all_new_b, u_all_g))
    u_pos_out = u_pos.at[idx, 0].set(jnp.where(is_pos, u_pos_new_b, u_pos_g))
    return loss, (u_all_out, u_pos_out)


# ----------------------------------------------------------------------------
# Pure-numpy reference mirroring the PyTorch forward exactly.
# ----------------------------------------------------------------------------
def _ref_forward_np(y_pred, y_true, index_s, u_all, u_pos, margin, gamma):
    y_pred = np.asarray(y_pred, np.float64).reshape(-1)
    y_true = np.asarray(y_true).reshape(-1)
    index_s = np.asarray(index_s).reshape(-1)
    u_all = np.asarray(u_all, np.float64).copy()
    u_pos = np.asarray(u_pos, np.float64).copy()

    pos = y_true == 1
    f_ps = y_pred[pos].reshape(-1, 1)
    index_ps = index_s[pos].reshape(-1)
    mat_data = np.tile(y_pred, (len(f_ps), 1))
    pos_mask = pos.reshape(-1)

    sur = np.maximum(margin - (f_ps - mat_data), 0.0) ** 2
    pos_sur = sur * pos_mask
    u_all[index_ps] = (1 - gamma) * u_all[index_ps] + gamma * sur.mean(1, keepdims=True)
    u_pos[index_ps] = (1 - gamma) * u_pos[index_ps] + gamma * pos_sur.mean(1, keepdims=True)
    p = (u_pos[index_ps] - u_all[index_ps] * pos_mask) / u_all[index_ps] ** 2
    loss = (p * sur).mean()
    return loss, u_all, u_pos


if __name__ == "__main__":
    margin, gamma = 1.0, 0.1
    data_length = 256
    N = 64  # batch size

    key = jax.random.PRNGKey(0)
    k1, k2, k3, k4, k5 = jax.random.split(key, 5)

    y_pred = jax.random.normal(k1, (N, 1), dtype=jnp.float32)
    y_true = jax.random.bernoulli(k2, 0.4, (N, 1)).astype(jnp.float32)
    y_true = y_true.at[0, 0].set(1.0)          # ensure at least one positive
    index_s = jax.random.permutation(k3, data_length)[:N].astype(jnp.int32)

    # The module initializes u_all/u_pos to zeros; with zeros the first-step
    # loss cancels to exactly 0, so warm-start the running stats to make the
    # numerical check non-degenerate (forward semantics are unchanged).
    u_all = (0.3 + jax.random.uniform(k4, (data_length, 1))).astype(jnp.float32)
    u_pos = (0.1 + 0.3 * jax.random.uniform(k5, (data_length, 1))).astype(jnp.float32)

    loss, (u_all_new, u_pos_new) = auprc_loss_forward(
        y_pred, y_true, index_s, u_all, u_pos, margin=margin, gamma=gamma)
    loss = jax.block_until_ready(loss)
    jax.block_until_ready((u_all_new, u_pos_new))

    ref_loss, ref_u_all, ref_u_pos = _ref_forward_np(
        np.array(y_pred), np.array(y_true), np.array(index_s),
        np.array(u_all), np.array(u_pos), margin, gamma)

    assert np.isfinite(float(loss))
    np.testing.assert_allclose(float(loss), float(ref_loss), rtol=5e-3, atol=1e-4)
    np.testing.assert_allclose(np.array(u_all_new), ref_u_all, rtol=5e-3, atol=1e-5)
    np.testing.assert_allclose(np.array(u_pos_new), ref_u_pos, rtol=5e-3, atol=1e-5)
    print("KERNEL_OK")
</pallas_src>

<mosaic_0001>
module attributes {stable_mosaic.version = 11 : i64} {
  func.func @_auprc_kernel(%arg0: i32, %arg1: memref<8x128xf32, #tpu.memory_space<vmem>>, %arg2: memref<128x1xf32, #tpu.memory_space<vmem>>, %arg3: memref<1x8x128xf32, #tpu.memory_space<vmem>>, %arg4: memref<1x8x128xf32, #tpu.memory_space<vmem>>) attributes {dimension_semantics = [#tpu.dimension_semantics<parallel>], iteration_bounds = array<i64: 1>, scalar_prefetch = 0 : i64, scratch_operands = 0 : i64, tpu.core_type = #tpu.core_type<tc>, window_params = [{pipeline_mode = #tpu.pipeline_mode<synchronous>, transform_indices = @transform_0, window_bounds = array<i64: 8, 128>}, {pipeline_mode = #tpu.pipeline_mode<synchronous>, transform_indices = @transform_1, window_bounds = array<i64: 128, 1>}, {transform_indices = @transform_2, window_bounds = array<i64: 1, 8, 128>}, {transform_indices = @transform_3, window_bounds = array<i64: 1, 8, 128>}]} {
    %c0 = arith.constant 0 : index
    %c0_0 = arith.constant 0 : index
    %0 = vector.load %arg1[%c0, %c0_0] : memref<8x128xf32, #tpu.memory_space<vmem>>, vector<8x128xf32>
    %c0_1 = arith.constant 0 : index
    %c0_2 = arith.constant 0 : index
    %1 = vector.load %arg2[%c0_1, %c0_2] : memref<128x1xf32, #tpu.memory_space<vmem>>, vector<128x1xf32>
    %c0_3 = arith.constant 0 : index
    %c0_4 = arith.constant 0 : index
    %c0_5 = arith.constant 0 : index
    %2 = vector.load %arg3[%c0_3, %c0_4, %c0_5] : memref<1x8x128xf32, #tpu.memory_space<vmem>>, vector<1x8x128xf32>
    %3 = vector.shape_cast %2 : vector<1x8x128xf32> to vector<8x128xf32>
    %4 = vector.extract_strided_slice %3 {offsets = [0, 0], sizes = [1, 128], strides = [1, 1]} : vector<8x128xf32> to vector<1x128xf32>
    %5 = vector.extract_strided_slice %3 {offsets = [1, 0], sizes = [1, 128], strides = [1, 1]} : vector<8x128xf32> to vector<1x128xf32>
    %6 = vector.extract_strided_slice %3 {offsets = [2, 0], sizes = [1, 128], strides = [1, 1]} : vector<8x128xf32> to vector<1x128xf32>
    %7 = vector.extract_strided_slice %3 {offsets = [3, 0], sizes = [1, 128], strides = [1, 1]} : vector<8x128xf32> to vector<1x128xf32>
    %cst = arith.constant 1.000000e+00 : f32
    %8 = vector.broadcast %cst : f32 to vector<1x128xf32>
    %9 = arith.subf %8, %4 : vector<1x128xf32>
    %10 = vector.broadcast %9 : vector<1x128xf32> to vector<128x128xf32>
    %11 = vector.broadcast %1 : vector<128x1xf32> to vector<128x128xf32>
    %12 = arith.addf %10, %11 : vector<128x128xf32>
    %cst_6 = arith.constant 0.000000e+00 : f32
    %13 = vector.broadcast %cst_6 : f32 to vector<128x128xf32>
    %14 = arith.maximumf %12, %13 : vector<128x128xf32>
    %15 = arith.mulf %14, %14 : vector<128x128xf32>
    %cst_7 = arith.constant dense<0.000000e+00> : vector<8x128xf32>
    %16 = tpu.matmul %0, %15, %cst_7 {dimension_numbers = #tpu.dot_dimension_numbers<[1], [0], [0], [1], [0, 0, 1, 1], [], []>, precision = #tpu.contract_precision<fp32>} : vector<8x128xf32>, vector<128x128xf32>, vector<8x128xf32> -> vector<8x128xf32>
    %17 = vector.extract_strided_slice %16 {offsets = [0, 0], sizes = [1, 128], strides = [1, 1]} : vector<8x128xf32> to vector<1x128xf32>
    %cst_8 = arith.constant 1.562500e-02 : f32
    %18 = vector.broadcast %cst_8 : f32 to vector<1x128xf32>
    %19 = arith.mulf %17, %18 : vector<1x128xf32>
    %20 = vector.extract_strided_slice %16 {offsets = [1, 0], sizes = [1, 128], strides = [1, 1]} : vector<8x128xf32> to vector<1x128xf32>
    %cst_9 = arith.constant 1.562500e-02 : f32
    %21 = vector.broadcast %cst_9 : f32 to vector<1x128xf32>
    %22 = arith.mulf %20, %21 : vector<1x128xf32>
    %cst_10 = arith.constant 0.899999976 : f32
    %23 = vector.broadcast %cst_10 : f32 to vector<1x128xf32>
    %24 = arith.mulf %23, %6 : vector<1x128xf32>
    %cst_11 = arith.constant 1.000000e-01 : f32
    %25 = vector.broadcast %cst_11 : f32 to vector<1x128xf32>
    %26 = arith.mulf %25, %19 : vector<1x128xf32>
    %27 = arith.addf %24, %26 : vector<1x128xf32>
    %cst_12 = arith.constant 0.899999976 : f32
    %28 = vector.broadcast %cst_12 : f32 to vector<1x128xf32>
    %29 = arith.mulf %28, %7 : vector<1x128xf32>
    %cst_13 = arith.constant 1.000000e-01 : f32
    %30 = vector.broadcast %cst_13 : f32 to vector<1x128xf32>
    %31 = arith.mulf %30, %22 : vector<1x128xf32>
    %32 = arith.addf %29, %31 : vector<1x128xf32>
    %cst_14 = arith.constant 1.000000e+00 : f32
    %33 = vector.broadcast %cst_14 : f32 to vector<1x128xf32>
    %34 = arith.subf %33, %5 : vector<1x128xf32>
    %35 = arith.addf %27, %34 : vector<1x128xf32>
    %36 = tpu.reciprocal %35 {approx = true} : vector<1x128xf32> -> vector<1x128xf32>
    %37 = arith.mulf %35, %36 : vector<1x128xf32>
    %cst_15 = arith.constant 2.000000e+00 : f32
    %38 = vector.broadcast %cst_15 : f32 to vector<1x128xf32>
    %39 = arith.subf %38, %37 : vector<1x128xf32>
    %40 = arith.mulf %36, %39 : vector<1x128xf32>
    %41 = arith.mulf %32, %19 : vector<1x128xf32>
    %42 = arith.mulf %27, %22 : vector<1x128xf32>
    %43 = arith.subf %41, %42 : vector<1x128xf32>
    %44 = arith.mulf %5, %43 : vector<1x128xf32>
    %45 = arith.mulf %40, %40 : vector<1x128xf32>
    %46 = arith.mulf %44, %45 : vector<1x128xf32>
    %cst_16 = arith.constant 0.000000e+00 : f32
    %47 = vector.broadcast %cst_16 : f32 to vector<5x128xf32>
    %48 = tpu.concatenate %27, %32, %46, %47 in 0 : vector<1x128xf32>, vector<1x128xf32>, vector<1x128xf32>, vector<5x128xf32> -> vector<8x128xf32>
    %c0_17 = arith.constant 0 : index
    %c0_18 = arith.constant 0 : index
    %c0_19 = arith.constant 0 : index
    %49 = vector.load %arg4[%c0_17, %c0_18, %c0_19] : memref<1x8x128xf32, #tpu.memory_space<vmem>>, vector<1x8x128xf32>
    %50 = vector.shape_cast %49 : vector<1x8x128xf32> to vector<8x128xf32>
    %51 = vector.shape_cast %48 : vector<8x128xf32> to vector<1x8x128xf32>
    tpu.vector_store %arg4[%c0_17, %c0_18, %c0_19], %51 {strides = array<i32>} : memref<1x8x128xf32, #tpu.memory_space<vmem>>, vector<1x8x128xf32>,
    return
  }
  func.func @transform_0(%arg0: i32) -> (i32, i32) {
    %c0_i32 = arith.constant 0 : i32
    %c0_i32_0 = arith.constant 0 : i32
    %c0_i32_1 = arith.constant 0 : i32
    return %c0_i32, %c0_i32_0 : i32, i32
  }
  func.func @transform_1(%arg0: i32) -> (i32, i32) {
    %c0_i32 = arith.constant 0 : i32
    %c0_i32_0 = arith.constant 0 : i32
    %c0_i32_1 = arith.constant 0 : i32
    return %c0_i32, %c0_i32_0 : i32, i32
  }
  func.func @transform_2(%arg0: i32) -> (i32, i32, i32) {
    %c0_i32 = arith.constant 0 : i32
    %c0_i32_0 = arith.constant 0 : i32
    %c0_i32_1 = arith.constant 0 : i32
    return %arg0, %c0_i32, %c0_i32_0 : i32, i32, i32
  }
  func.func @transform_3(%arg0: i32) -> (i32, i32, i32) {
    %c0_i32 = arith.constant 0 : i32
    %c0_i32_0 = arith.constant 0 : i32
    %c0_i32_1 = arith.constant 0 : i32
    return %arg0, %c0_i32, %c0_i32_0 : i32, i32, i32
  }
}

</mosaic_0001>

<bundles_post_ra>
// kernel: tpu_custom_call.1
= control target key start
LH: loop header
LB: loop body
LE: loop exit
PB: predicated region body
PF: predicated region fallthrough
CT: control target
= control target key end

     0   :  { %v1365_v2 = vmov 0   ;;  %s1802_s0 = inlined_call_operand.vmem [shape: f32[8,128], index: 0, kind: input, shape index: {}]   ;;  %s1803_s1 = inlined_call_operand.vmem [shape: f32[128,1], index: 1, kind: input, shape index: {}]   ;;  %s1804_s2 = inlined_call_operand.vmem [shape: f32[1,8,128], index: 2, kind: input, shape index: {}]   ;;  %s1805_s3 = inlined_call_operand.hbm [shape: f32[1,8,128], index: 3, kind: output, shape index: {}]  }
   0x1   :  { %v18_v0 = vld [vmem:[%s1803_s1 + $0x10] sm:$0xff]  ;;  %v16_v1 = vld [vmem:[%s1803_s1] sm:$0xff]  ;;  %1338 = vset.pattern.permute.xlu1 %v1365_v2  ;;  %1337 = vset.pattern.permute.xlu0 %v1365_v2  ;;  %v19_v3 = vld [vmem:[%s1803_s1 + $0x18] sm:$0xff] }
   0x2   :  { %50 = vperm.xlu1 %1338, %v18_v0   ;;  %40 = vperm.xlu0 %1337, %v16_v1   ;;  %v17_v4 = vld [vmem:[%s1803_s1 + $0x8] sm:$0xff] }
   0x3   :  { %8 = vsyncpa [#allocation3], 0  ;;  %v21_v5 = vld [vmem:[%s1803_s1 + $0x28] sm:$0xff]  ;;  %v20_v6 = vld [vmem:[%s1803_s1 + $0x20] sm:$0xff]  ;;  %v1366_v11 = vmov 0.0|0.0   ;;  %vm1367_vm0 = vmmov 0   ;;  %v34_v19 = vlaneseq }
   0x4   :  { %v23_v7 = vld [vmem:[%s1803_s1 + $0x38] sm:$0xff]  ;;  %v22_v8 = vld [vmem:[%s1803_s1 + $0x30] sm:$0xff]  ;;  %v25_v9 = vld [vmem:[%s1803_s1 + $0x48] sm:$0xff]  ;;  %1179 = vmatprep.subr.bf16.mxu1 %v1366_v11  ;;  %1251 = vmatprep.subr.bf16.mxu0 %v1366_v11  ;;  %v1368_v18 = vmov 0.0   ;;  %vm848_vm1 = vcmask 1041408   ;;  %vm850_vm2 = vcmask 1042432  }
   0x5   :  { %v24_v10 = vld [vmem:[%s1803_s1 + $0x40] sm:$0xff]  ;;  %v27_v12 = vld [vmem:[%s1803_s1 + $0x58] sm:$0xff]  ;;  %v26_v13 = vld [vmem:[%s1803_s1 + $0x50] sm:$0xff]  ;;  %1001 = vmatprep.mubr.msk.f32.mxu1 %vm1367_vm0, %v1368_v18  ;;  %1106 = vmatprep.mubr.msk.f32.mxu0 %vm1367_vm0, %v1368_v18  ;;  %v35_v20 = vshrl.u32 %v34_v19, 7 }
   0x6   :  { %55 = vperm.xlu1 %1338, %v19_v3   ;;  %45 = vperm.xlu0 %1337, %v17_v4   ;;  %v29_v14 = vld [vmem:[%s1803_s1 + $0x68] sm:$0xff]  ;;  %v28_v15 = vld [vmem:[%s1803_s1 + $0x60] sm:$0xff]  ;;  %v31_v16 = vld [vmem:[%s1803_s1 + $0x78] sm:$0xff] }
   0x7   :  { %v30_v17 = vld [vmem:[%s1803_s1 + $0x70] sm:$0xff]  ;;  %v1447_v21 = vld [vmem:[%s1804_s2] sm:$0xff]  ;;  %v36_v23 = vsub.s32 0, %v35_v20 }
   0x8   :  { %v33_v22 = vsub.f32 1.0, %v1447_v21 }
   0xa   :  { %65 = vperm.xlu1 %1338, %v21_v5   ;;  %60 = vperm.xlu0 %1337, %v20_v6   ;;  %v1452_v24 = vrot.slane %v33_v22, %v36_v23 }
   0xe   :  { %75 = vperm.xlu1 %1338, %v23_v7   ;;  %70 = vperm.xlu0 %1337, %v22_v8  }
  0x12   :  { %85 = vperm.xlu1 %1338, %v25_v9   ;;  %80 = vperm.xlu0 %1337, %v24_v10  }
  0x16   :  { %95 = vperm.xlu1 %1338, %v27_v12   ;;  %90 = vperm.xlu0 %1337, %v26_v13  }
  0x1a   :  { %105 = vperm.xlu1 %1338, %v29_v14   ;;  %100 = vperm.xlu0 %1337, %v28_v15  }
  0x1e   :  { %115 = vperm.xlu1 %1338, %v31_v16   ;;  %110 = vperm.xlu0 %1337, %v30_v17  }
  0x81   :  { %v51_v25 = vpop.permute.xlu1 %50  ;;  %v41_v26 = vpop.permute.xlu0 %40 }
  0x82   :  { %v118_v27 = vadd.f32 %v41_v26, %v1452_v24  ;;  %v120_v32 = vadd.f32 %v51_v25, %v1452_v24 }
  0x84   :  { %v134_v33 = vmax.f32 %v118_v27, 0.0  ;;  %v136_v41 = vmax.f32 %v120_v32, 0.0 }
  0x85   :  { %v56_v28 = vpop.permute.xlu1 %55  ;;  %v46_v29 = vpop.permute.xlu0 %45 }
  0x86   :  { %v121_v30 = vadd.f32 %v56_v28, %v1452_v24  ;;  %v119_v31 = vadd.f32 %v46_v29, %v1452_v24  ;;  %v1462_v42 = vmul.f32 %v134_v33, %v134_v33  ;;  %v1469_v51 = vmul.f32 %v136_v41, %v136_v41  ;;  %v15_v28 = vld [vmem:[%s1802_s0] sm:$0xff]  ;;  %s1369_s0 = smov [#allocation2]  }
  0x87   :  { %s859_s19 = sshll.u32 %s1369_s0, 4  ;;  %s860_s19 = int_to_ptr.vmem [resolvable:$true] %s859_s19 }
  0x88   :  { %v135_v34 = vmax.f32 %v119_v31, 0.0  ;;  %v137_v37 = vmax.f32 %v121_v30, 0.0  ;;  %v167_v52 = vand.u32 4294901760, %v1462_v42  ;;  %v173_v62 = vand.u32 4294901760, %v1469_v51  ;;  %s1341_s20 = scalar_lea.vmem %s860_s19, 128  ;;  %p1346_p1 = scmp.lt.s32.totalorder %s860_s19, %s860_s19 }
  0x89   :  { %v66_v35 = vpop.permute.xlu1 %65  ;;  %v61_v36 = vpop.permute.xlu0 %60  ;;  %p1342_p0 = scmp.ne.s32.totalorder %s860_s19, %s1341_s20  ;;  %p1347_p2 = scmp.lt.s32.totalorder %s1341_s20, %s1341_s20 }
  0x8a   :  { %v1458_v38 = vmul.f32 %v135_v34, %v135_v34  ;;  %v123_v39 = vadd.f32 %v66_v35, %v1452_v24  ;;  %v122_v40 = vadd.f32 %v61_v36, %v1452_v24  ;;  %v1464_v45 = vmul.f32 %v137_v37, %v137_v37 }
  0x8b   :  { %p1348_p3 = por %p1347_p2, %p1346_p1 }
  0x8c   :  { %v170_v46 = vand.u32 4294901760, %v1458_v38  ;;  %v139_v47 = vmax.f32 %v123_v39, 0.0  ;;  %v138_v48 = vmax.f32 %v122_v40, 0.0  ;;  %v176_v55 = vand.u32 4294901760, %v1464_v45 }
  0x8d   :  { %v76_v43 = vpop.permute.xlu1 %75  ;;  %v71_v44 = vpop.permute.xlu0 %70  ;;  %v1542_v39 = vand.u32 4294901760, %v15_v28  ;;  %p1349_p4 = pnand %p1348_p3, %p1342_p0 }
  0x8e   :  { %v125_v49 = vadd.f32 %v76_v43, %v1452_v24  ;;  %v124_v50 = vadd.f32 %v71_v44, %v1452_v24  ;;  %v1477_v57 = vpack.c.bf16 %v170_v46, %v167_v52  ;;  %v1480_v59 = vmul.f32 %v139_v47, %v139_v47 }
  0x8f   :  { %v1482_v60 = vmul.f32 %v138_v48, %v138_v48  ;;  %v1496_v4 = vpack.c.bf16 %v176_v55, %v173_v62  ;;  %v1550_v41 = vsub.f32 %v1458_v38, %v170_v46  ;;  %v1567_v38 = vsub.f32 %v15_v28, %v1542_v39 }
  0x90   :  { %v141_v56 = vmax.f32 %v125_v49, 0.0  ;;  %v140_v61 = vmax.f32 %v124_v50, 0.0  ;;  %1181 = vmatpush3.bf16.msra.mxu1 %v1477_v57  ;;  %1253 = vmatpush3.bf16.msra.mxu0 %v1477_v57  ;;  %v182_v6 = vand.u32 4294901760, %v1480_v59  ;;  %v1572_v46 = vsub.f32 %v1462_v42, %v167_v52 }
  0x91   :  { %v86_v53 = vpop.permute.xlu1 %85  ;;  %v81_v54 = vpop.permute.xlu0 %80  ;;  %1182 = vmatprep.subr.bf16.mxu1 %v1366_v11  ;;  %1254 = vmatprep.subr.bf16.mxu0 %v1366_v11  ;;  %v179_v7 = vand.u32 4294901760, %v1482_v60 }
  0x92   :  { %v127_v58 = vadd.f32 %v86_v53, %v1452_v24  ;;  %v126_v63 = vadd.f32 %v81_v54, %v1452_v24  ;;  %v1490_v2 = vmul.f32 %v141_v56, %v141_v56  ;;  %v1501_v8 = vmul.f32 %v140_v61, %v140_v61 }
  0x93   :  { %v1518_v23 = vpack.c.bf16 %v182_v6, %v179_v7  ;;  %v1579_v53 = vsub.f32 %v1464_v45, %v176_v55  ;;  %v267_v54 = vand.u32 4294901760, %v1550_v41  ;;  %v249_v55 = vand.u32 4294901760, %v1567_v38 }
  0x94   :  { %v143_v3 = vmax.f32 %v127_v58, 0.0  ;;  %v142_v9 = vmax.f32 %v126_v63, 0.0  ;;  %1184 = vmatpush3.bf16.msra.mxu1 %v1496_v4  ;;  %1256 = vmatpush3.bf16.msra.mxu0 %v1496_v4  ;;  %v188_v14 = vand.u32 4294901760, %v1490_v2  ;;  %v185_v19 = vand.u32 4294901760, %v1501_v8 }
  0x95   :  { %v96_v0 = vpop.permute.xlu1 %95  ;;  %v91_v1 = vpop.permute.xlu0 %90  ;;  %1185 = vmatprep.subr.bf16.mxu1 %v1366_v11  ;;  %1257 = vmatprep.subr.bf16.mxu0 %v1366_v11  ;;  %v1600_v61 = vsub.f32 %v1469_v51, %v173_v62  ;;  %v260_v63 = vand.u32 4294901760, %v1572_v46  ;;  %v1617_v51 = vsub.f32 %v1482_v60, %v179_v7 }
  0x96   :  { %v129_v5 = vadd.f32 %v96_v0, %v1452_v24  ;;  %v128_v10 = vadd.f32 %v91_v1, %v1452_v24  ;;  %v1509_v15 = vmul.f32 %v143_v3, %v143_v3  ;;  %v1512_v20 = vmul.f32 %v142_v9, %v142_v9 }
  0x97   :  { %v1539_v36 = vpack.c.bf16 %v188_v14, %v185_v19  ;;  %v281_v0 = vand.u32 4294901760, %v1579_v53  ;;  %v268_v1 = vsub.f32 %v1550_v41, %v267_v54  ;;  %v1610_v3 = vsub.f32 %v1480_v59, %v182_v6 }
  0x98   :  { %v145_v16 = vmax.f32 %v129_v5, 0.0  ;;  %v144_v17 = vmax.f32 %v128_v10, 0.0  ;;  %1187 = vmatpush3.bf16.msra.mxu1 %v1518_v23  ;;  %1259 = vmatpush3.bf16.msra.mxu0 %v1518_v23  ;;  %v194_v29 = vand.u32 4294901760, %v1509_v15  ;;  %v191_v34 = vand.u32 4294901760, %v1512_v20 }
  0x99   :  { %v106_v12 = vpop.permute.xlu1 %105  ;;  %v101_v13 = vpop.permute.xlu0 %100  ;;  %1188 = vmatprep.subr.bf16.mxu1 %v1366_v11  ;;  %1260 = vmatprep.subr.bf16.mxu0 %v1366_v11  ;;  %v250_v59 = vsub.f32 %v1567_v38, %v249_v55  ;;  %v274_v6 = vand.u32 4294901760, %v1600_v61  ;;  %v261_v10 = vsub.f32 %v1572_v46, %v260_v63  ;;  %v282_v60 = vsub.f32 %v1579_v53, %v281_v0 }
  0x9a   :  { %v131_v25 = vadd.f32 %v106_v12, %v1452_v24  ;;  %v130_v26 = vadd.f32 %v101_v13, %v1452_v24  ;;  %v1528_v30 = vmul.f32 %v145_v16, %v145_v16  ;;  %v1530_v31 = vmul.f32 %v144_v17, %v144_v17 }
  0x9b   :  { %v295_v7 = vand.u32 4294901760, %v1610_v3  ;;  %v1637_v12 = vsub.f32 %v1490_v2, %v188_v14  ;;  %v269_v13 = vand.u32 4294901760, %v268_v1  ;;  %v288_v16 = vand.u32 4294901760, %v1617_v51 }
  0x9c   :  { %v147_v32 = vmax.f32 %v131_v25, 0.0  ;;  %v146_v35 = vmax.f32 %v130_v26, 0.0  ;;  %1190 = vmatpush3.bf16.msra.mxu1 %v1539_v36  ;;  %1262 = vmatpush3.bf16.msra.mxu0 %v1539_v36  ;;  %v200_v43 = vand.u32 4294901760, %v1528_v30  ;;  %v197_v44 = vand.u32 4294901760, %v1530_v31 }
  0x9d   :  { %v116_v27 = vpop.permute.xlu1 %115  ;;  %v111_v33 = vpop.permute.xlu0 %110  ;;  %1191 = vmatprep.subr.bf16.mxu1 %v1366_v11  ;;  %1263 = vmatprep.subr.bf16.mxu0 %v1366_v11  ;;  %v1645_v17 = vsub.f32 %v1501_v8, %v185_v19  ;;  %v251_v2 = vand.u32 4294901760, %v250_v59  ;;  %v275_v14 = vsub.f32 %v1600_v61, %v274_v6  ;;  %v262_v26 = vand.u32 4294901760, %v261_v10 }
  0x9e   :  { %v133_v37 = vadd.f32 %v116_v27, %v1452_v24  ;;  %v132_v40 = vadd.f32 %v111_v33, %v1452_v24  ;;  %v1554_v47 = vmul.f32 %v147_v32, %v147_v32  ;;  %v1558_v48 = vmul.f32 %v146_v35, %v146_v35 }
  0x9f   :  { %v1564_v24 = vpack.c.bf16 %v194_v29, %v191_v34  ;;  %v1594_v45 = vpack.c.bf16 %v200_v43, %v197_v44  ;;  %v1657_v27 = vsub.f32 %v1509_v15, %v194_v29  ;;  %v1662_v8 = vsub.f32 %v1512_v20, %v191_v34 }
  0xa0   :  { %v149_v49 = vmax.f32 %v133_v37, 0.0  ;;  %v148_v50 = vmax.f32 %v132_v40, 0.0  ;;  %v206_v56 = vand.u32 4294901760, %v1554_v47  ;;  %v203_v42 = vand.u32 4294901760, %v1558_v48 }
  0xa1   :  { %1193 = vmatpush3.bf16.msra.mxu1 %v1564_v24  ;;  %1265 = vmatpush3.bf16.msra.mxu0 %v1564_v24  ;;  %v283_v19 = vand.u32 4294901760, %v282_v60  ;;  %v296_v28 = vsub.f32 %v1610_v3, %v295_v7  ;;  %v309_v32 = vand.u32 4294901760, %v1637_v12  ;;  %v289_v15 = vsub.f32 %v1617_v51, %v288_v16 }
  0xa2   :  { %1194 = vmatprep.subr.bf16.mxu1 %v1366_v11  ;;  %1266 = vmatprep.subr.bf16.mxu0 %v1366_v11  ;;  %v1586_v52 = vmul.f32 %v149_v49, %v149_v49  ;;  %v1588_v58 = vmul.f32 %v148_v50, %v148_v50  ;;  %v1625_v9 = vpack.c.bf16 %v206_v56, %v203_v42  ;;  %v302_v29 = vand.u32 4294901760, %v1645_v17 }
  0xa3   :  { %v1204_v33 = vpack.c.bf16 %v269_v13, %v262_v26  ;;  %v1276_v20 = vpack.c.bf16 %v267_v54, %v260_v63  ;;  %v276_v34 = vand.u32 4294901760, %v275_v14  ;;  %v323_v35 = vand.u32 4294901760, %v1657_v27 }
  0xa4   :  { %v212_v62 = vand.u32 4294901760, %v1586_v52  ;;  %v209_v5 = vand.u32 4294901760, %v1588_v58  ;;  %v316_v37 = vand.u32 4294901760, %v1662_v8  ;;  %v297_v40 = vand.u32 4294901760, %v296_v28 }
  0xa5   :  { %1196 = vmatpush3.bf16.msra.mxu1 %v1594_v45  ;;  %1268 = vmatpush3.bf16.msra.mxu0 %v1594_v45  ;;  %v310_v49 = vsub.f32 %v1637_v12, %v309_v32  ;;  %v1678_v50 = vsub.f32 %v1528_v30, %v200_v43  ;;  %v1683_v54 = vsub.f32 %v1530_v31, %v197_v44 }
  0xa6   :  { %1197 = vmatprep.subr.bf16.mxu1 %v1366_v11  ;;  %1269 = vmatprep.subr.bf16.mxu0 %v1366_v11  ;;  %v1651_v25 = vpack.c.bf16 %v212_v62, %v209_v5  ;;  %v303_v63 = vsub.f32 %v1645_v17, %v302_v29  ;;  %v1207_v1 = vpack.c.bf16 %v283_v19, %v276_v34 }
  0xa7   :  { %v1279_v59 = vpack.c.bf16 %v281_v0, %v274_v6  ;;  %v324_v30 = vsub.f32 %v1657_v27, %v323_v35  ;;  %v317_v31 = vsub.f32 %v1662_v8, %v316_v37  ;;  %v337_v43 = vand.u32 4294901760, %v1678_v50 }
  0xa8   :  { %v330_v44 = vand.u32 4294901760, %v1683_v54  ;;  %v1699_v0 = vsub.f32 %v1554_v47, %v206_v56  ;;  %v1704_v6 = vsub.f32 %v1558_v48, %v203_v42  ;;  %v311_v10 = vand.u32 4294901760, %v310_v49 }
  0xa9   :  { %1199 = vmatpush3.bf16.msra.mxu1 %v1625_v9  ;;  %1271 = vmatpush3.bf16.msra.mxu0 %v1625_v9  ;;  %v304_v60 = vand.u32 4294901760, %v303_v63  ;;  %v325_v14 = vand.u32 4294901760, %v324_v30  ;;  %v318_v26 = vand.u32 4294901760, %v317_v31  ;;  %v338_v47 = vsub.f32 %v1678_v50, %v337_v43 }
  0xaa   :  { %1200 = vmatprep.subr.bf16.mxu1 %v1366_v11  ;;  %1272 = vmatprep.subr.bf16.mxu0 %v1366_v11  ;;  %v331_v56 = vsub.f32 %v1683_v54, %v330_v44  ;;  %v351_v19 = vand.u32 4294901760, %v1699_v0  ;;  %v344_v48 = vand.u32 4294901760, %v1704_v6  ;;  %v1717_v42 = vsub.f32 %v1586_v52, %v212_v62 }
  0xab   :  { %v1285_v28 = vpack.c.bf16 %v309_v32, %v302_v29  ;;  %v1291_v63 = vpack.c.bf16 %v337_v43, %v330_v44  ;;  %v1228_v43 = vpack.c.bf16 %v1550_v41, %v1572_v46  ;;  %v1231_v44 = vpack.c.bf16 %v1579_v53, %v1600_v61 }
  0xac   :  { %v345_v34 = vsub.f32 %v1704_v6, %v344_v48  ;;  %v365_v52 = vand.u32 4294901760, %v1717_v42 }
  0xad   :  { %1202 = vmatpush3.bf16.msra.mxu1 %v1651_v25  ;;  %1274 = vmatpush3.bf16.msra.mxu0 %v1651_v25 }
  0xae   :  { %1203 = vmatprep.subr.bf16.mxu1 %v1366_v11  ;;  %1275 = vmatprep.subr.bf16.mxu0 %v1366_v11  ;;  %v346_v29 = vand.u32 4294901760, %v345_v34 }
  0xb0   :  { %1002 = vmatmul.mubr.f32.vlgmr.msra.gmra.mrb[0].mxu1 %v251_v2  ;;  %1107 = vmatmul.mubr.f32.vlgmr.msra.gmra.mrb[0].mxu0 %v249_v55  ;;  %v290_v55 = vand.u32 4294901760, %v289_v15  ;;  %v1282_v2 = vpack.c.bf16 %v295_v7, %v288_v16  ;;  %v1722_v7 = vsub.f32 %v1588_v58, %v209_v5  ;;  %v1213_v16 = vpack.c.bf16 %v311_v10, %v304_v60 }
  0xb1   :  { %1205 = vmatpush3.bf16.msra.mxu1 %v1204_v33  ;;  %1277 = vmatpush3.bf16.msra.mxu0 %v1276_v20  ;;  %v339_v15 = vand.u32 4294901760, %v338_v47  ;;  %v332_v33 = vand.u32 4294901760, %v331_v56  ;;  %v352_v20 = vsub.f32 %v1699_v0, %v351_v19  ;;  %v1216_v58 = vpack.c.bf16 %v325_v14, %v318_v26 }
  0xb2   :  { %1206 = vmatprep.subr.bf16.mxu1 %v1366_v11  ;;  %1278 = vmatprep.subr.bf16.mxu0 %v1366_v11  ;;  %v1210_v13 = vpack.c.bf16 %v297_v40, %v290_v55  ;;  %v358_v62 = vand.u32 4294901760, %v1722_v7  ;;  %v1288_v5 = vpack.c.bf16 %v323_v35, %v316_v37  ;;  %v366_v40 = vsub.f32 %v1717_v42, %v365_v52 }
  0xb3   :  { %1036 = vmatprep.mubr.msk.f32.mxu1 %vm1367_vm0, %v1368_v18  ;;  %1141 = vmatprep.mubr.msk.f32.mxu0 %vm1367_vm0, %v1368_v18  ;;  %v353_v32 = vand.u32 4294901760, %v352_v20  ;;  %v1219_v55 = vpack.c.bf16 %v339_v15, %v332_v33  ;;  %v1249_v41 = vpack.c.bf16 %v1717_v42, %v1722_v7 }
  0xb4   :  { %v359_v49 = vsub.f32 %v1722_v7, %v358_v62  ;;  %v367_v35 = vand.u32 4294901760, %v366_v40  ;;  %v1297_v31 = vpack.c.bf16 %v365_v52, %v358_v62 }
  0xb5   :  { %1208 = vmatpush3.bf16.msra.mxu1 %v1207_v1  ;;  %1280 = vmatpush3.bf16.msra.mxu0 %v1279_v59  ;;  %v1222_v1 = vpack.c.bf16 %v353_v32, %v346_v29  ;;  %v1294_v59 = vpack.c.bf16 %v351_v19, %v344_v48 }
  0xb6   :  { %1209 = vmatprep.subr.bf16.mxu1 %v1366_v11  ;;  %1281 = vmatprep.subr.bf16.mxu0 %v1366_v11  ;;  %v360_v37 = vand.u32 4294901760, %v359_v49 }
  0xb8   :  { %v1225_v30 = vpack.c.bf16 %v367_v35, %v360_v37 }
  0xb9   :  { %1211 = vmatpush3.bf16.msra.mxu1 %v1210_v13  ;;  %1283 = vmatpush3.bf16.msra.mxu0 %v1282_v2 }
  0xba   :  { %1212 = vmatprep.subr.bf16.mxu1 %v1366_v11  ;;  %1284 = vmatprep.subr.bf16.mxu0 %v1366_v11 }
  0xbd   :  { %1214 = vmatpush3.bf16.msra.mxu1 %v1213_v16  ;;  %1286 = vmatpush3.bf16.msra.mxu0 %v1285_v28 }
  0xbe   :  { %1215 = vmatprep.subr.bf16.mxu1 %v1366_v11  ;;  %1287 = vmatprep.subr.bf16.mxu0 %v1366_v11 }
  0xc1   :  { %1217 = vmatpush3.bf16.msra.mxu1 %v1216_v58  ;;  %1289 = vmatpush3.bf16.msra.mxu0 %v1288_v5 }
  0xc2   :  { %1218 = vmatprep.subr.bf16.mxu1 %v1366_v11  ;;  %1290 = vmatprep.subr.bf16.mxu0 %v1366_v11 }
  0xc5   :  { %1220 = vmatpush3.bf16.msra.mxu1 %v1219_v55  ;;  %1292 = vmatpush3.bf16.msra.mxu0 %v1291_v63 }
  0xc6   :  { %1221 = vmatprep.subr.bf16.mxu1 %v1366_v11  ;;  %1293 = vmatprep.subr.bf16.mxu0 %v1366_v11 }
  0xc9   :  { %1223 = vmatpush3.bf16.msra.mxu1 %v1222_v1  ;;  %1295 = vmatpush3.bf16.msra.mxu0 %v1294_v59 }
  0xca   :  { %1224 = vmatprep.subr.bf16.mxu1 %v1366_v11  ;;  %1296 = vmatprep.subr.bf16.mxu0 %v1366_v11 }
  0xcd   :  { %1226 = vmatpush3.bf16.msra.mxu1 %v1225_v30  ;;  %1298 = vmatpush3.bf16.msra.mxu0 %v1297_v31 }
  0xce   :  { %1227 = vmatprep.subr.bf16.mxu1 %v1366_v11  ;;  %1299 = vmatprep.subr.bf16.mxu0 %v1366_v11 }
  0xd0   :  { %1037 = vmatmul.mubr.f32.vlgmr.msra.gmra.mrb[0].mxu1 %v1542_v39  ;;  %1142 = vmatmul.mubr.f32.vlgmr.msra.gmra.mrb[0].mxu0 %v1542_v39 }
  0xd1   :  { %1229 = vmatpush3.bf16.msra.mxu1 %v1228_v43  ;;  %1301 = vmatpush3.bf16.msra.mxu0 %v1477_v57  ;;  %v1234_v57 = vpack.c.bf16 %v1610_v3, %v1617_v51  ;;  %v808_v51 = vmul.f32 0.9, %v1447_v21 }
  0xd2   :  { %1230 = vmatprep.subr.bf16.mxu1 %v1366_v11  ;;  %1302 = vmatprep.subr.bf16.mxu0 %v1366_v11 }
  0xd3   :  { %1071 = vmatprep.mubr.msk.f32.mxu1 %vm1367_vm0, %v1368_v18  ;;  %1176 = vmatprep.mubr.msk.f32.mxu0 %vm1367_vm0, %v1368_v18  ;;  %v1237_v18 = vpack.c.bf16 %v1637_v12, %v1645_v17  ;;  %v815_v12 = vrot.slane %v33_v22, 7 }
  0xd5   :  { %1232 = vmatpush3.bf16.msra.mxu1 %v1231_v44  ;;  %1304 = vmatpush3.bf16.msra.mxu0 %v1496_v4  ;;  %v1240_v4 = vpack.c.bf16 %v1657_v27, %v1662_v8 }
  0xd6   :  { %1233 = vmatprep.subr.bf16.mxu1 %v1366_v11  ;;  %1305 = vmatprep.subr.bf16.mxu0 %v1366_v11 }
  0xd9   :  { %1235 = vmatpush3.bf16.msra.mxu1 %v1234_v57  ;;  %1307 = vmatpush3.bf16.msra.mxu0 %v1518_v23  ;;  %v1243_v23 = vpack.c.bf16 %v1678_v50, %v1683_v54 }
  0xda   :  { %1236 = vmatprep.subr.bf16.mxu1 %v1366_v11  ;;  %1308 = vmatprep.subr.bf16.mxu0 %v1366_v11 }
  0xdd   :  { %1238 = vmatpush3.bf16.msra.mxu1 %v1237_v18  ;;  %1310 = vmatpush3.bf16.msra.mxu0 %v1539_v36  ;;  %v1246_v36 = vpack.c.bf16 %v1699_v0, %v1704_v6 }
  0xde   :  { %1239 = vmatprep.subr.bf16.mxu1 %v1366_v11  ;;  %1311 = vmatprep.subr.bf16.mxu0 %v1366_v11 }
  0xe1   :  { %1241 = vmatpush3.bf16.msra.mxu1 %v1240_v4  ;;  %1313 = vmatpush3.bf16.msra.mxu0 %v1564_v24 }
  0xe2   :  { %1242 = vmatprep.subr.bf16.mxu1 %v1366_v11  ;;  %1314 = vmatprep.subr.bf16.mxu0 %v1366_v11 }
  0xe5   :  { %1244 = vmatpush3.bf16.msra.mxu1 %v1243_v23  ;;  %1316 = vmatpush3.bf16.msra.mxu0 %v1594_v45 }
  0xe6   :  { %1245 = vmatprep.subr.bf16.mxu1 %v1366_v11  ;;  %1317 = vmatprep.subr.bf16.mxu0 %v1366_v11 }
  0xe9   :  { %1247 = vmatpush3.bf16.msra.mxu1 %v1246_v36  ;;  %1319 = vmatpush3.bf16.msra.mxu0 %v1625_v9 }
  0xea   :  { %1248 = vmatprep.subr.bf16.mxu1 %v1366_v11  ;;  %1320 = vmatprep.subr.bf16.mxu0 %v1366_v11 }
  0xed   :  { %1250 = vmatpush3.bf16.msra.mxu1 %v1249_v41  ;;  %1322 = vmatpush3.bf16.msra.mxu0 %v1651_v25 }
  0xf0   :  { %1072 = vmatmul.mubr.f32.vlgmr.msra.gmra.mrb[0].mxu1 %v1567_v38  ;;  %1177 = vmatmul.mubr.f32.vlgmr.msra.gmra.mrb[0].mxu0 %v1542_v39 }
 0x1c3   :  { %v508_v24 = vpop.f32.mrb[0].mxu1  ;;  %v803_v46 = vpop.f32.mrb[0].mxu0 }
 0x1c4   :  { %v1323_v53 = vadd.f32 %v803_v46, %v508_v24  ;;  %v1073_v45 = vpop.f32.mrb[1].mxu1  ;;  %v1178_v61 = vpop.f32.mrb[1].mxu0 }
 0x1c6   :  { %v807_v3 = vmul.f32 0.015625, %v1323_v53 }
 0x1c8   :  { %v809_v9 = vmul.f32 0.1, %v807_v3  ;;  %v826_v25 = vrot.slane %v807_v3, 7  ;;  %v823_v8 = vrot.slane %v807_v3, 5 }
 0x1ca   :  { %v811_v11 = vrot.slane %v809_v9, 6 }
 0x1cc   :  { %v813_v17 = vadd.f32 %v811_v11, %v808_v51 }
 0x1ce   :  { %v817_v27 = vadd.f32 %v815_v12, %v813_v17  ;;  %v828_v38 = vmul.f32 %v826_v25, %v813_v17  ;;  %v825_v50 = vmul.f32 %v823_v8, %v813_v17  ;;  %v843_v22 = vrot.slane %v813_v17, 2 }
 0x1d0   :  { %1339 = vrcp.f32 %v817_v27  ;;  %v830_v39 = vrot.slane %v828_v38, 7 }
 0x1d2   :  { %v832_v0 = vsub.f32 %v825_v50, %v830_v39 }
 0x1d4   :  { %v834_v60 = vrot.slane %v832_v0, 2 }
 0x1d6   :  { %v836_v14 = vmul.f32 %v834_v60, %v1447_v21 }
 0x1da   :  { %v1340_v54 = vpop.eup %1339 }
 0x1db   :  { %v819_v6 = vmul.f32 %v1340_v54, %v817_v27 }
 0x1dd   :  { %v820_v10 = vsub.f32 2.0, %v819_v6 }
 0x1df   :  { %v821_v13 = vmul.f32 %v1340_v54, %v820_v10 }
 0x1e1   :  { %v837_v2 = vmul.f32 %v821_v13, %v821_v13 }
 0x1e3   :  { %v839_v26 = vrot.slane %v837_v2, 1 }
 0x1e5   :  { %v841_v47 = vmul.f32 %v839_v26, %v836_v14 }
 0x1e7   :  { %v846_v56 = vrot.slane %v841_v47, 7 }
 0x1e9   :  { %v849_v19 = vsel %vm848_vm1, %v843_v22, %v846_v56 }
 0x1ea   :  { %v851_v48 = vsel %vm850_vm2, %v849_v19, 0.0 }
 0x1eb   :  { %852 = vst [vmem:[#allocation2] sm:$0xff] %v851_v48 }
 0x1ec   :  { %1352 = shalt.err (!%p1349_p4)
}
 0x1ed   :  { %s1353_s23 = scalar_lea.hbm %s1805_s3, 128 }
 0x1ee   :  { %p1354_p5 = scmp.ne.s32.totalorder %s1805_s3, %s1353_s23  ;;  %p1357_p6 = scmp.lt.u32.totalorder %s1353_s23, %s1805_s3 }
 0x1f0   :  { %p1359_p7 = pnand %p1357_p6, %p1354_p5 }
 0x1f2   :  { %1362 = shalt.err (!%p1359_p7)
}
 0x1f3   :  { %862 = dma.vmem_to_hbm [thread:$0]  %s860_s19, 128, %s1805_s3, [#allocation3]  }
 0x1f4   :  { %1363 = dma.done.wait [#allocation3], 128  }
 0x1f5   :  { %1364 = vsyncadd [#allocation3], 4294967168 }
 0x1f6   :  { %866 = vsyncpa [#allocation3], 1 }

</bundles_post_ra>
